<compile_context>
chip_gen: v6e
topology: v6e:2x2x1
jax: 0.10.0
libtpu: 0.0.40
codegen_flags: <defaults>
</compile_context>

<pallas_src>
import jax
import jax.numpy as jnp
from jax import lax
from jax.experimental import pallas as pl
from jax.experimental.pallas import tpu as pltpu


def _mlp_layer_kernel(x_ref, w_ref, o_ref, h_ref):
    """One grid step = one layer applied to one batch tile.

    x_ref: (TB, D)      input batch tile (f32)
    w_ref: (1, D, D)    this layer's weight, PyTorch (out, in) layout
    o_ref: (TB, D)      output batch tile (written only on the last layer)
    h_ref: (TB, D) f32  VMEM scratch holding the running activation
    """
    layer = pl.program_id(1)

    @pl.when(layer == 0)
    def _init():
        h_ref[...] = x_ref[...].astype(jnp.float32)

    w = w_ref[0]                               # (D_out, D_in)
    h_in = h_ref[...].astype(w.dtype)          # bf16 path: cast activations per layer
    # h @ W.T without an XLU transpose: contract h dim 1 with W dim 1 (in_features).
    h_ref[...] = lax.dot_general(
        h_in, w,
        dimension_numbers=(((1,), (1,)), ((), ())),
        preferred_element_type=jnp.float32,
    )

    @pl.when(layer == pl.num_programs(1) - 1)
    def _finalize():
        o_ref[...] = h_ref[...].astype(o_ref.dtype)


def _round_up(x, m):
    return ((x + m - 1) // m) * m


def simple_linear_forward(src, weights, *, weight_dtype=None, batch_tile=8):
    """src: (B, D) f32; weights: (L, D, D) in (out, in) layout (square: layers chain)."""
    b, d_in = src.shape
    n_layers, d_out, d_in_w = weights.shape
    assert d_in == d_in_w and d_out == d_in, "chained bias-free Linears require square weights"

    if weight_dtype is not None:
        weights = weights.astype(weight_dtype)
    w_dtype = weights.dtype

    # Hardware-friendly padding: lanes multiple of 128, sublanes (batch) multiple of 8.
    # Zero padding is exact here: padded weight rows/cols contribute zeros through the chain.
    d_pad = _round_up(max(d_in, 128), 128)
    batch_tile = _round_up(batch_tile, 8)
    b_pad = _round_up(max(b, batch_tile), batch_tile)

    x_p = jnp.zeros((b_pad, d_pad), jnp.float32).at[:b, :d_in].set(src.astype(jnp.float32))
    w_p = jnp.zeros((n_layers, d_pad, d_pad), w_dtype).at[:, :d_out, :d_in].set(weights)

    grid = (b_pad // batch_tile, n_layers)

    # Per-grid-step VMEM residency (double-buffered in/out + scratch), with headroom.
    # TODO(synk): for very large D (f32 weight tile > ~16 MiB, i.e. D >= ~2048) add a K/N
    #             tile axis so the per-layer weight block stays within v7x's 64 MiB VMEM.
    w_bytes = d_pad * d_pad * jnp.dtype(w_dtype).itemsize
    io_bytes = batch_tile * d_pad * 4
    needed = 2 * w_bytes + 4 * io_bytes + io_bytes
    vmem_limit = int(min(64 * 1024 * 1024, max(16 * 1024 * 1024, 2 * needed)))

    cost = pl.CostEstimate(
        flops=2 * n_layers * b_pad * d_pad * d_pad,
        transcendentals=0,
        bytes_accessed=n_layers * w_bytes + 2 * b_pad * d_pad * 4,
    )

    out_p = pl.pallas_call(
        _mlp_layer_kernel,
        out_shape=jax.ShapeDtypeStruct((b_pad, d_pad), jnp.float32),
        grid_spec=pltpu.PrefetchScalarGridSpec(
            num_scalar_prefetch=0,
            grid=grid,
            in_specs=[
                pl.BlockSpec((batch_tile, d_pad), lambda i, l: (i, 0)),
                pl.BlockSpec((1, d_pad, d_pad), lambda i, l: (l, 0, 0)),
            ],
            out_specs=pl.BlockSpec((batch_tile, d_pad), lambda i, l: (i, 0)),
            scratch_shapes=[pltpu.VMEM((batch_tile, d_pad), jnp.float32)],
        ),
        compiler_params=pltpu.CompilerParams(
            dimension_semantics=("parallel", "arbitrary"),
            vmem_limit_bytes=vmem_limit,
        ),
        cost_estimate=cost,
    )(x_p, w_p)

    return out_p[:b, :d_out]


def init_weights(key, layers, input_size, output_size):
    """Deterministic init mimicking nn.Linear default: U(-1/sqrt(fan_in), 1/sqrt(fan_in))."""
    bound = 1.0 / jnp.sqrt(jnp.float32(input_size))
    keys = jax.random.split(key, layers)
    ws = [
        jax.random.uniform(k, (output_size, input_size), jnp.float32, -bound, bound)
        for k in keys
    ]
    return jnp.stack(ws, axis=0)  # (L, out, in)


if __name__ == "__main__":
    bs = 2            # SimpleLinear.bs = 2
    input_size = 32
    output_size = 32  # square so multiple layers compose
    layers = 3

    key = jax.random.PRNGKey(0)
    k_w, k_src, k_tgt = jax.random.split(key, 3)

    weights = init_weights(k_w, layers, input_size, output_size)
    src = jax.random.uniform(k_src, (bs, input_size), jnp.float32)
    tgt = jax.random.uniform(k_tgt, (bs, input_size), jnp.float32)  # unused in forward (matches PyTorch)

    # Plain-JAX reference (PyTorch f32 semantics).
    ref = src
    for l in range(layers):
        ref = ref @ weights[l].T

    # f32-weight path: exact nn.Linear semantics, tight tolerance.
    out = jax.block_until_ready(simple_linear_forward(src, weights))
    assert out.shape == (bs, output_size)
    assert jnp.allclose(out, ref, atol=1e-5, rtol=1e-5), "f32 mismatch vs reference"

    # bf16-weight path (halves weight HBM traffic, f32 accumulation): looser tolerance.
    out_bf16 = jax.block_until_ready(
        simple_linear_forward(src, weights, weight_dtype=jnp.bfloat16)
    )
    assert out_bf16.shape == (bs, output_size)
    assert jnp.allclose(out_bf16, ref, atol=5e-2, rtol=5e-2), "bf16 mismatch vs reference"

    print("KERNEL_OK")
</pallas_src>

<mosaic_0001>
module attributes {stable_mosaic.version = 11 : i64} {
  func.func @_mlp_layer_kernel(%arg0: i32, %arg1: i32, %arg2: memref<8x128xf32, #tpu.memory_space<vmem>>, %arg3: memref<1x128x128xf32, #tpu.memory_space<vmem>>, %arg4: memref<8x128xf32, #tpu.memory_space<vmem>>, %arg5: memref<8x128xf32, #tpu.memory_space<vmem>>) attributes {dimension_semantics = [#tpu.dimension_semantics<parallel>, #tpu.dimension_semantics<arbitrary>], iteration_bounds = array<i64: 1, 3>, scalar_prefetch = 0 : i64, scratch_operands = 1 : i64, tpu.core_type = #tpu.core_type<tc>, window_params = [{transform_indices = @transform_0, window_bounds = array<i64: 8, 128>}, {transform_indices = @transform_1, window_bounds = array<i64: 1, 128, 128>}, {transform_indices = @transform_2, window_bounds = array<i64: 8, 128>}]} {
    %c0_i32 = arith.constant 0 : i32
    %0 = arith.cmpi eq, %arg1, %c0_i32 : i32
    %1 = arith.extui %0 : i1 to i32
    %c0_i32_0 = arith.constant 0 : i32
    %2 = arith.cmpi ne, %1, %c0_i32_0 : i32
    scf.if %2 {
      %c0_8 = arith.constant 0 : index
      %c0_9 = arith.constant 0 : index
      %11 = vector.load %arg2[%c0_8, %c0_9] : memref<8x128xf32, #tpu.memory_space<vmem>>, vector<8x128xf32>
      %c0_10 = arith.constant 0 : index
      %c0_11 = arith.constant 0 : index
      %12 = vector.load %arg5[%c0_10, %c0_11] : memref<8x128xf32, #tpu.memory_space<vmem>>, vector<8x128xf32>
      tpu.vector_store %arg5[%c0_10, %c0_11], %11 {strides = array<i32>} : memref<8x128xf32, #tpu.memory_space<vmem>>, vector<8x128xf32>,
    } else {
    }
    %c0 = arith.constant 0 : index
    %c0_1 = arith.constant 0 : index
    %c0_2 = arith.constant 0 : index
    %3 = vector.load %arg3[%c0, %c0_1, %c0_2] : memref<1x128x128xf32, #tpu.memory_space<vmem>>, vector<1x128x128xf32>
    %4 = vector.shape_cast %3 : vector<1x128x128xf32> to vector<128x128xf32>
    %c0_3 = arith.constant 0 : index
    %c0_4 = arith.constant 0 : index
    %5 = vector.load %arg5[%c0_3, %c0_4] : memref<8x128xf32, #tpu.memory_space<vmem>>, vector<8x128xf32>
    %cst = arith.constant dense<0.000000e+00> : vector<8x128xf32>
    %6 = tpu.matmul %5, %4, %cst {dimension_numbers = #tpu.dot_dimension_numbers<[1], [1], [0], [0], [0, 0, 1, 0], [], []>} : vector<8x128xf32>, vector<128x128xf32>, vector<8x128xf32> -> vector<8x128xf32>
    %c0_5 = arith.constant 0 : index
    %c0_6 = arith.constant 0 : index
    %7 = vector.load %arg5[%c0_5, %c0_6] : memref<8x128xf32, #tpu.memory_space<vmem>>, vector<8x128xf32>
    tpu.vector_store %arg5[%c0_5, %c0_6], %6 {strides = array<i32>} : memref<8x128xf32, #tpu.memory_space<vmem>>, vector<8x128xf32>,
    %c2_i32 = arith.constant 2 : i32
    %8 = arith.cmpi eq, %arg1, %c2_i32 : i32
    %9 = arith.extui %8 : i1 to i32
    %c0_i32_7 = arith.constant 0 : i32
    %10 = arith.cmpi ne, %9, %c0_i32_7 : i32
    scf.if %10 {
      %c0_8 = arith.constant 0 : index
      %c0_9 = arith.constant 0 : index
      %11 = vector.load %arg5[%c0_8, %c0_9] : memref<8x128xf32, #tpu.memory_space<vmem>>, vector<8x128xf32>
      %c0_10 = arith.constant 0 : index
      %c0_11 = arith.constant 0 : index
      %12 = vector.load %arg4[%c0_10, %c0_11] : memref<8x128xf32, #tpu.memory_space<vmem>>, vector<8x128xf32>
      tpu.vector_store %arg4[%c0_10, %c0_11], %11 {strides = array<i32>} : memref<8x128xf32, #tpu.memory_space<vmem>>, vector<8x128xf32>,
    } else {
    }
    return
  }
  func.func @transform_0(%arg0: i32, %arg1: i32) -> (i32, i32) {
    %c0_i32 = arith.constant 0 : i32
    %c0_i32_0 = arith.constant 0 : i32
    return %arg0, %c0_i32 : i32, i32
  }
  func.func @transform_1(%arg0: i32, %arg1: i32) -> (i32, i32, i32) {
    %c0_i32 = arith.constant 0 : i32
    %c0_i32_0 = arith.constant 0 : i32
    %c0_i32_1 = arith.constant 0 : i32
    return %arg1, %c0_i32, %c0_i32_0 : i32, i32, i32
  }
  func.func @transform_2(%arg0: i32, %arg1: i32) -> (i32, i32) {
    %c0_i32 = arith.constant 0 : i32
    %c0_i32_0 = arith.constant 0 : i32
    return %arg0, %c0_i32 : i32, i32
  }
}

</mosaic_0001>

<bundles_post_ra>
// kernel: tpu_custom_call.1
= control target key start
LH: loop header
LB: loop body
LE: loop exit
PB: predicated region body
PF: predicated region fallthrough
CT: control target
= control target key end

     0   :  { %7 = vsyncpa [#allocation4], 0  ;;  %s832_s0 = inlined_call_operand.hbm [shape: f32[8,128], index: 0, kind: input, shape index: {}]   ;;  %s833_s1 = inlined_call_operand.hbm [shape: f32[3,128,128], index: 1, kind: input, shape index: {}]   ;;  %s834_s2 = inlined_call_operand.hbm [shape: f32[8,128], index: 2, kind: output, shape index: {}]  }
   0x1   :  { %8 = vsyncpa [#allocation7], 0 }
   0x2   :  { %10 = vsyncpa [#allocation7 + $0x1], 0 }
   0x3   :  { %11 = vsyncpa [#allocation5], 0  ;;  %s677_s9 = smov 0   ;;  %s679_s10 = smov 0  }
   0x4   :  { %s681_s11 = smov 0   ;;  %s683_s12 = smov 0  }
   0x5   :  { %s685_s13 = smov 0   ;;  %s687_s14 = smov 0  }
   0x6 LB: > { %s371_s15 = sadd.s32 4294967295, %s653_s14   ;;  %s62_s16 = sadd.s32 1, %s641_s11  ;;  %s653_s14 = sphi %s687_s14, %s17_s14   ;;  %s649_s13 = sphi %s685_s13, %s849_s13   ;;  %s645_s12 = sphi %s683_s12, %s848_s12   ;;  %s641_s11 = sphi %s681_s11, %s847_s11   ;;  %s637_s10 = sphi %s679_s10, %s846_s10   ;;  %s633_s9 = sphi %s677_s9, %s845_s9  }
   0x7   : > { %p69_p0 = scmp.ne.s32.totalorder %s641_s11, %s637_s10  ;;  %p70_p1 = scmp.eq.s32.totalorder %s653_s14, 0 }
   0x8   : > { %p75_p2 = scmp.ne.s32.totalorder %s637_s10, %s633_s9  ;;  %p713_p3 = scmp.eq.s32.totalorder %s371_s15, 0 }
   0x9   : > { %p71_p4 = por %p70_p1, %p69_p0  ;;  %p372_p5 = scmp.ge.s32.totalorder %s653_s14, 1 }
   0xa   : > { %p720_p6 = por %p713_p3, %p75_p2  ;;  %p112_p7 = scmp.lt.s32.totalorder %s653_s14, 4 }
   0xb   : > { %s655_s20 = smov [#allocation3]   ;;  %p459_p10 = scmp.lt.s32.totalorder %s653_s14, 3 }
   0xc   : > { %s838_s18 = scalar_select %p720_p6, 1, 0 }
   0xd   : > { %p725_p8 = pnand %p372_p5, %p112_p7  ;;  %s127_s21 = sshll.u32 %s655_s20, 4  ;;  %s128_s21 = int_to_ptr.vmem [resolvable:$true] %s127_s21 }
   0xe   : > { %s138_s22 = sand.u32 1, %s641_s11   ;;  %p735_p12 = pnand %p459_p10, %p71_p4 }
   0xf   : > { %s839_s19 = scalar_select %p725_p8, 1, 0 }
  0x10   : > { %p450_p9 = pneg %p725_p8  ;;  %s528_s24 = scalar_lea.vmem %s128_s21, 128 }
  0x11   : > { %p529_p0 = scmp.ne.s32.totalorder %s128_s21, %s528_s24  ;;  %p536_p5 = scmp.lt.s32.totalorder %s128_s21, %s128_s21 }
  0x12   : > { %p451_p11 = pnand %p450_p9, %p713_p3  ;;  %p537_p7 = scmp.lt.s32.totalorder %s528_s24, %s528_s24 }
  0x14   : > { %p519_p13 = pneg %p451_p11  ;;  %p538_p6 = por %p537_p7, %p536_p5 }
  0x16   : > { %p531_p1 = pnand %p529_p0, %p519_p13 }
  0x18   : > { %p532_p2 = pneg %p531_p1 }
  0x1a   : > { %p539_p8 = pnand %p538_p6, %p532_p2 }
  0x1c   : > { %542 = shalt.err (!%p539_p8)
}
  0x1d   : > { %453 = dma.hbm_to_vmem [thread:$0]  (!%p451_p11), %s832_s0, 128, %s128_s21, [#allocation4]  }
  0x1e   : > { %s26_s27 = sadd.s32 1, %s649_s13  ;;  %s375_s28 = sshll.u32 %s138_s22, 7 }
  0x1f   : > { %p27_p4 = scmp.ge.s32.totalorder %s26_s27, 3  ;;  %s387_s29 = sshll.u32 %s649_s13, 11 }
  0x20   : > { %s142_s30 = scalar_lea.vmem [#allocation6], %s375_s28  ;;  %s148_s6 = scalar_lea.hbm %s833_s1, %s387_s29 }
  0x21   : > { %s149_s3 = sshll.u32 %s142_s30, 4  ;;  %s851_s27 = smov (%p27_p4, %s26_s27), 0  ;;  %s150_s3 = int_to_ptr.vmem [resolvable:$true] %s149_s3 }
  0x22   : > { %s59_s7 = ssub.s32 %s649_s13, %s851_s27  ;;  %s139_s9 = scalar_lea.sflag [#allocation7], %s138_s22 }
  0x23   : > { %p751_p6 = scmp.eq.s32.totalorder %s59_s7, 0  ;;  %p545_p8 = pneg %p735_p12 }
  0x24   : > { %s556_s20 = scalar_lea.vmem %s150_s3, 2048  ;;  %s656_s21 = smov [#allocation6]  }
  0x25   : > { %p557_p9 = scmp.ne.s32.totalorder %s150_s3, %s556_s20  ;;  %s561_s24 = sshll.u32 %s656_s21, 4  ;;  %s562_s24 = int_to_ptr.vmem [resolvable:$false] %s561_s24 }
  0x26   : > { %s563_s25 = scalar_lea.vmem %s562_s24, 4096  ;;  %p564_p13 = scmp.lt.s32.totalorder %s150_s3, %s562_s24 }
  0x27   : > { %p559_p10 = pnand %p557_p9, %p545_p8  ;;  %p565_p0 = scmp.lt.s32.totalorder %s563_s25, %s556_s20 }
  0x29   : > { %p560_p11 = pneg %p559_p10  ;;  %p566_p1 = por %p565_p0, %p564_p13 }
  0x2b   : > { %p567_p2 = pnand %p566_p1, %p560_p11 }
  0x2d   : > { %570 = shalt.err (!%p567_p2)
}
  0x2e   : > { %s657_s26 = smov 128   ;;  %s658_s22 = smov 8  }
  0x2f   : > { %457 = dma.hbm_to_vmem [thread:$0]  (!%p735_p12), %s148_s6, 2048, %s150_s3, %s139_s9, %s657_s26, %s657_s26, %s658_s22  }
  0x30   : > { %s764_s28 = scalar_select %p751_p6, %s641_s11, %s62_s16  }
  0x31   : > { %p842_p5 = scmp.ne.s32.totalorder %s839_s19, 0 }
  0x33   : > { %161 = sbr.rel (%p842_p5) target bundleno = 352 (0x160), region = 28 }
  0x38   : > { %620 = dma.done.wait (%p713_p3), [#allocation4], 128  }
  0x39   : > { %622 = vsyncadd (%p713_p3), [#allocation4], 4294967168  ;;  %s167_s29 = sand.u32 1, %s637_s10   ;;  %p843_p12 = scmp.ne.s32.totalorder %s838_s18, 0 }
  0x3a   : > { %s380_s30 = sshll.u32 %s167_s29, 7  ;;  %s168_s4 = scalar_lea.sflag [#allocation7], %s167_s29 }
  0x3b   : > { %s773_s23 = scalar_lea.vmem [#allocation6], %s380_s30 }
  0x3c   : > { %624 = dma.done.wait (%p843_p12), %s168_s4, 2048  }
  0x3d   : > { %626 = vsyncadd (%p843_p12), %s168_s4, 4294965248  ;;  %p381_p7 = scmp.ne.s32.totalorder %s645_s12, 0 }
  0x3f   : > { %190 = sbr.rel (%p381_p7) target bundleno = 70 (0x46), region = 40 }
  0x44   : > { %v191_v0 = vld [vmem:[#allocation3] sm:$0xff] }
  0x45   : > { %192 = vst [vmem:[#allocation2] sm:$0xff] %v191_v0 }
  0x46 PF: > { %v208_v1 = vld [vmem:[%s773_s23 + $0x78] sm:$0xff]  ;;  %v659_v2 = vmov 0.0   ;;  %vm660_vm0 = vmmov 0   ;;  %v207_v3 = vld [vmem:[%s773_s23 + $0x70] sm:$0xff]  ;;  %v206_v4 = vld [vmem:[%s773_s23 + $0x68] sm:$0xff]  ;;  %p382_p3 = scmp.ne.s32.totalorder %s645_s12, 2 }
  0x47   : > { %405 = vmatprep.subr.mxu0 %v659_v2  ;;  %437 = vmatprep.mubr.msk.f32.mxu0 %vm660_vm0, %v659_v2  ;;  %v205_v5 = vld [vmem:[%s773_s23 + $0x60] sm:$0xff]  ;;  %v204_v6 = vld [vmem:[%s773_s23 + $0x58] sm:$0xff]  ;;  %v203_v7 = vld [vmem:[%s773_s23 + $0x50] sm:$0xff] }
  0x48   : > { %406 = vmatpush3.xpose.msra.mxu0 %v208_v1  ;;  %v202_v8 = vld [vmem:[%s773_s23 + $0x48] sm:$0xff]  ;;  %v201_v9 = vld [vmem:[%s773_s23 + $0x40] sm:$0xff]  ;;  %v200_v10 = vld [vmem:[%s773_s23 + $0x38] sm:$0xff] }
  0x49   : > { %407 = vmatprep.subr.mxu0 %v659_v2  ;;  %v199_v11 = vld [vmem:[%s773_s23 + $0x30] sm:$0xff]  ;;  %v198_v12 = vld [vmem:[%s773_s23 + $0x28] sm:$0xff]  ;;  %v197_v13 = vld [vmem:[%s773_s23 + $0x20] sm:$0xff] }
  0x4a   : > { %v196_v14 = vld [vmem:[%s773_s23 + $0x18] sm:$0xff]  ;;  %v195_v15 = vld [vmem:[%s773_s23 + $0x10] sm:$0xff]  ;;  %v194_v16 = vld [vmem:[%s773_s23 + $0x8] sm:$0xff] }
  0x4b   : > { %v193_v17 = vld [vmem:[%s773_s23] sm:$0xff] }
  0x4c   : > { %408 = vmatpush3.xpose.msra.mxu0 %v207_v3  ;;  %v209_v18 = vld [vmem:[#allocation2] sm:$0xff] }
  0x4d   : > { %409 = vmatprep.subr.mxu0 %v659_v2 }
  0x50   : > { %410 = vmatpush3.xpose.msra.mxu0 %v206_v4 }
  0x51   : > { %411 = vmatprep.subr.mxu0 %v659_v2 }
  0x54   : > { %412 = vmatpush3.xpose.msra.mxu0 %v205_v5 }
  0x55   : > { %413 = vmatprep.subr.mxu0 %v659_v2 }
  0x58   : > { %414 = vmatpush3.xpose.msra.mxu0 %v204_v6 }
  0x59   : > { %415 = vmatprep.subr.mxu0 %v659_v2 }
  0x5c   : > { %416 = vmatpush3.xpose.msra.mxu0 %v203_v7 }
  0x5d   : > { %417 = vmatprep.subr.mxu0 %v659_v2 }
  0x60   : > { %418 = vmatpush3.xpose.msra.mxu0 %v202_v8 }
  0x61   : > { %419 = vmatprep.subr.mxu0 %v659_v2 }
  0x64   : > { %420 = vmatpush3.xpose.msra.mxu0 %v201_v9 }
  0x65   : > { %421 = vmatprep.subr.mxu0 %v659_v2 }
  0x68   : > { %422 = vmatpush3.xpose.msra.mxu0 %v200_v10 }
  0x69   : > { %423 = vmatprep.subr.mxu0 %v659_v2 }
  0x6c   : > { %424 = vmatpush3.xpose.msra.mxu0 %v199_v11 }
  0x6d   : > { %425 = vmatprep.subr.mxu0 %v659_v2 }
  0x70   : > { %426 = vmatpush3.xpose.msra.mxu0 %v198_v12 }
  0x71   : > { %427 = vmatprep.subr.mxu0 %v659_v2 }
  0x74   : > { %428 = vmatpush3.xpose.msra.mxu0 %v197_v13 }
  0x75   : > { %429 = vmatprep.subr.mxu0 %v659_v2 }
  0x78   : > { %430 = vmatpush3.xpose.msra.mxu0 %v196_v14 }
  0x79   : > { %431 = vmatprep.subr.mxu0 %v659_v2 }
  0x7c   : > { %432 = vmatpush3.xpose.msra.mxu0 %v195_v15 }
  0x7d   : > { %433 = vmatprep.subr.mxu0 %v659_v2 }
  0x80   : > { %434 = vmatpush3.xpose.msra.mxu0 %v194_v16 }
  0x81   : > { %435 = vmatprep.subr.mxu0 %v659_v2 }
  0x84   : > { %436 = vmatpush3.xpose.msra.mxu0 %v193_v17 }
  0x87   : > { %438 = vmatmul.mubr.f32.vlgmr.msra.gmra.mxu0 %v209_v18 }
 0x145   : > { %284 = sbr.rel (%p382_p3) target bundleno = 337 (0x151), region = 44 }
 0x147   : > { %v276_v19 = vpop.f32.mrf.mxu0 }
 0x148   : > { %280 = vst [vmem:[#allocation2] sm:$0xff] %v276_v19 }
 0x149   : > { %v439_v20 = vpop.f32.mrf.mxu0 }
 0x14f   : > { %v285_v21 = vld [vmem:[#allocation2] sm:$0xff] }
 0x150   : > { %286 = vst [vmem:[#allocation8] sm:$0xff] %v285_v21 }
 0x151 PF: > { %p799_p4 = scmp.eq.s32.totalorder %s371_s15, 2  ;;  %s661_s17 = smov [#allocation8]  }
 0x152   : > { %s296_s18 = sshll.u32 %s661_s17, 4  ;;  %s297_s18 = int_to_ptr.vmem [resolvable:$true] %s296_s18 }
 0x153   : > { %s571_s19 = scalar_lea.vmem %s297_s18, 128  ;;  %p578_p10 = scmp.lt.s32.totalorder %s297_s18, %s297_s18 }
 0x154   : > { %p572_p6 = scmp.ne.s32.totalorder %s297_s18, %s571_s19  ;;  %p579_p11 = scmp.lt.s32.totalorder %s571_s19, %s571_s19 }
 0x156   : > { %p573_p8 = pnand %p572_p6, %p799_p4  ;;  %p580_p13 = por %p579_p11, %p578_p10 }
 0x158   : > { %p574_p9 = pneg %p573_p8 }
 0x15a   : > { %p581_p0 = pnand %p580_p13, %p574_p9 }
 0x15c   : > { %584 = shalt.err (!%p581_p0)
}
 0x15d   : > { %447 = dma.vmem_to_hbm [thread:$0]  (%p799_p4), %s297_s18, 128, %s834_s2, [#allocation5]  }
 0x15e   : > { %628 = dma.done.wait (%p799_p4), [#allocation5], 128  }
 0x15f   : > { %630 = vsyncadd (%p799_p4), [#allocation5], 4294967168 }
 0x160 PF: > { %s17_s14 = sadd.s32 1, %s653_s14   ;;  %s845_s9 = smov %s637_s10 }
 0x161   : > { %p14_p1 = scmp.ge.s32.totalorder %s17_s14, 5   ;;  %s846_s10 = smov %s641_s11 }
 0x162   : > { %s847_s11 = smov %s764_s28  ;;  %s848_s12 = smov %s649_s13 }
 0x163   : > { %s849_s13 = smov %s851_s27  ;;  %16 = sbr.rel (!%p14_p1) target bundleno = 6 (0x6), region = 80 }
 0x168   :  { %309 = vsyncpa [#allocation4], 1 }
 0x169   :  { %311 = vsyncpa [#allocation4 + $0x1], 1 }
 0x16a   :  { %312 = vsyncpa [#allocation7], 1 }
 0x16b   :  { %314 = vsyncpa [#allocation7 + $0x1], 1 }
 0x16c   :  { %315 = vsyncpa [#allocation5], 1 }
 0x16d   :  { %317 = vsyncpa [#allocation5 + $0x1], 1 }

</bundles_post_ra>
